<compile_context>
chip_gen: v7x
topology: tpu7x:2x2x1
jax: 0.10.0
libtpu: 0.0.40
codegen_flags: <defaults>
</compile_context>

<pallas_src>
import functools

import jax
import jax.numpy as jnp
from jax.experimental import pallas as pl
from jax.experimental.pallas import tpu as pltpu


def _round_up(x, m):
    return ((x + m - 1) // m) * m


def _cdiv(a, b):
    return -(-a // b)


def _predictor_kernel(state_ref, act_ref, w1s_ref, w1ab_ref, w2_ref, b2_ref, o_ref):
    # state: [tb, S] f32, act: [tb, 1] int32
    # w1s:   [S, H],  w1ab: [A, H] (= w1_a + b1),  w2: [H, S],  b2: [1, S]
    s = state_ref[...]
    a = act_ref[...]                                   # [tb, 1] int32
    tb = s.shape[0]
    num_actions = w1ab_ref.shape[0]

    # In-kernel one-hot (row-select of w1_ab via a tiny MXU matmul).
    onehot = (jax.lax.broadcasted_iota(jnp.int32, (tb, num_actions), 1) == a).astype(s.dtype)

    h = (jnp.dot(s, w1s_ref[...], preferred_element_type=jnp.float32)
         + jnp.dot(onehot, w1ab_ref[...], preferred_element_type=jnp.float32))
    h = jnp.maximum(h, 0.0)                            # ReLU (VALU slack)
    y = jnp.dot(h, w2_ref[...], preferred_element_type=jnp.float32) + b2_ref[...]
    o_ref[...] = y.astype(o_ref.dtype)                 # [tb, S] store, no lane padding


def prepare_params(logical_params, *, state_dim, action_dim):
    """Split w1 into state/action halves and fold b1 into the action half."""
    w1, b1, w2, b2 = logical_params                    # w1:[S+A,H] b1:[1,H] w2:[H,S] b2:[1,S]
    w1_s = w1[:state_dim]                              # [S, H]
    w1_ab = w1[state_dim:state_dim + action_dim] + b1  # [A, H]; valid since onehot rows sum to 1
    return w1_s, w1_ab, w2, b2


def _pick_tile(batch, tile_b):
    """Pick a batch tile: big (amortize step overhead), >=2 grid steps when the
    batch allows (v7x megacore), and dividing the 8-aligned batch when feasible
    (no wrapper-side pad pass)."""
    b8 = _round_up(max(batch, 8), 8)
    target = min(_round_up(tile_b, 8), _round_up(_cdiv(b8, 2), 8), b8)
    target = max(target, 8)
    tb = target
    if b8 % tb != 0:
        cand = target
        while cand >= 8 and b8 % cand != 0:
            cand -= 8
        # Accept a divisor only if it doesn't shrink the tile more than ~4x
        # (otherwise per-step overhead starts to dominate again).
        if cand >= 8 and cand * 4 >= target:
            tb = cand
    b_pad = _round_up(b8, tb)
    return tb, b_pad


@functools.partial(jax.jit,
                   static_argnames=("action_dim", "state_dim", "tile_b", "min_pallas_batch"))
def predictor_forward(state, action, kernel_params, *, action_dim, state_dim,
                      tile_b=2048, min_pallas_batch=0):
    """state: [B, state_dim] f32, action: [B] or [B,1] int -> [B, state_dim] f32."""
    w1_s, w1_ab, w2, b2 = kernel_params
    B = state.shape[0]
    H = w1_s.shape[1]
    S = state_dim
    A = action_dim

    # Tiny-batch fast path: pallas_call launch overhead dominates; XLA fuses
    # the whole MLP into one trivial kernel. (Production would use ~512.)
    if B < min_pallas_batch:
        onehot = jax.nn.one_hot(action.reshape(B), A, dtype=state.dtype)
        h = jnp.maximum(state @ w1_s + onehot @ w1_ab, 0.0)
        return h @ w2 + b2

    act = action.reshape(B, 1).astype(jnp.int32)

    tb, B_pad = _pick_tile(B, tile_b)
    if B_pad != B:
        # Only hit when no reasonable divisor tile exists or B % 8 != 0.
        state_in = jnp.pad(state, ((0, B_pad - B), (0, 0)))
        act_in = jnp.pad(act, ((0, B_pad - B), (0, 0)))   # padded actions = 0 (valid, sliced off)
    else:
        state_in, act_in = state, act

    grid = (B_pad // tb,)

    out = pl.pallas_call(
        _predictor_kernel,
        out_shape=jax.ShapeDtypeStruct((B_pad, S), state.dtype),
        grid_spec=pltpu.PrefetchScalarGridSpec(
            num_scalar_prefetch=0,
            grid=grid,
            in_specs=[
                pl.BlockSpec((tb, S), lambda i: (i, 0)),   # state tile
                pl.BlockSpec((tb, 1), lambda i: (i, 0)),   # action tile (int32)
                pl.BlockSpec((S, H), lambda i: (0, 0)),    # w1_s  (VMEM-resident)
                pl.BlockSpec((A, H), lambda i: (0, 0)),    # w1_ab (VMEM-resident)
                pl.BlockSpec((H, S), lambda i: (0, 0)),    # w2    (VMEM-resident)
                pl.BlockSpec((1, S), lambda i: (0, 0)),    # b2    (VMEM-resident)
            ],
            out_specs=pl.BlockSpec((tb, S), lambda i: (i, 0)),
        ),
        compiler_params=pltpu.CompilerParams(
            dimension_semantics=("parallel",),
        ),
    )(state_in, act_in, w1_s, w1_ab, w2, b2)

    return out[:B] if B_pad != B else out


def init_params(key, action_dim, state_dim, hidden):
    """Deterministic init mimicking nn.Linear's uniform(-1/sqrt(fan_in), ...)."""
    k1, k2, k3, k4 = jax.random.split(key, 4)
    in1 = state_dim + action_dim
    lim1 = 1.0 / jnp.sqrt(jnp.float32(in1))
    lim2 = 1.0 / jnp.sqrt(jnp.float32(hidden))
    w1 = jax.random.uniform(k1, (in1, hidden), jnp.float32, -lim1, lim1)
    b1 = jax.random.uniform(k2, (1, hidden), jnp.float32, -lim1, lim1)
    w2 = jax.random.uniform(k3, (hidden, state_dim), jnp.float32, -lim2, lim2)
    b2 = jax.random.uniform(k4, (1, state_dim), jnp.float32, -lim2, lim2)
    return w1, b1, w2, b2


if __name__ == "__main__":
    ACTION_DIM = 4
    STATE_DIM = 16
    HIDDEN = 32

    key = jax.random.PRNGKey(0)
    kp, kd = jax.random.split(key, 2)

    logical_params = init_params(kp, ACTION_DIM, STATE_DIM, HIDDEN)
    kernel_params = prepare_params(logical_params, state_dim=STATE_DIM, action_dim=ACTION_DIM)
    w1, b1, w2, b2 = logical_params

    def reference(state, action):
        onehot = jax.nn.one_hot(action.reshape(-1), ACTION_DIM, dtype=jnp.float32)
        x = jnp.concatenate([state, onehot], axis=1)
        return jnp.maximum(x @ w1 + b1, 0.0) @ w2 + b2

    # batch=8: single-tile path; batch=1030: ragged batch + multi-step grid.
    for batch in (8, 1030):
        bkey = jax.random.fold_in(kd, batch)
        ks, ka = jax.random.split(bkey)
        state = jax.random.normal(ks, (batch, STATE_DIM), jnp.float32)
        action = jax.random.randint(ka, (batch, 1), 0, ACTION_DIM, jnp.int32)

        out = predictor_forward(state, action, kernel_params,
                                action_dim=ACTION_DIM, state_dim=STATE_DIM,
                                min_pallas_batch=0)   # force the Pallas path in the demo
        out = jax.block_until_ready(out)

        ref = reference(state, action)
        assert out.shape == (batch, STATE_DIM)
        assert jnp.allclose(out, ref, atol=1e-5, rtol=1e-5)

    print("KERNEL_OK")
</pallas_src>

<mosaic_0001>
module attributes {stable_mosaic.version = 11 : i64} {
  func.func @_predictor_kernel(%arg0: i32, %arg1: memref<8x16xf32, #tpu.memory_space<vmem>>, %arg2: memref<8x1xi32, #tpu.memory_space<vmem>>, %arg3: memref<16x32xf32, #tpu.memory_space<vmem>>, %arg4: memref<4x32xf32, #tpu.memory_space<vmem>>, %arg5: memref<32x16xf32, #tpu.memory_space<vmem>>, %arg6: memref<1x16xf32, #tpu.memory_space<vmem>>, %arg7: memref<8x16xf32, #tpu.memory_space<vmem>>) attributes {dimension_semantics = [#tpu.dimension_semantics<parallel>], iteration_bounds = array<i64: 1>, scalar_prefetch = 0 : i64, scratch_operands = 0 : i64, tpu.core_type = #tpu.core_type<tc>, window_params = [{transform_indices = @transform_0, window_bounds = array<i64: 8, 16>}, {transform_indices = @transform_1, window_bounds = array<i64: 8, 1>}, {pipeline_mode = #tpu.pipeline_mode<synchronous>, transform_indices = @transform_2, window_bounds = array<i64: 16, 32>}, {pipeline_mode = #tpu.pipeline_mode<synchronous>, transform_indices = @transform_3, window_bounds = array<i64: 4, 32>}, {pipeline_mode = #tpu.pipeline_mode<synchronous>, transform_indices = @transform_4, window_bounds = array<i64: 32, 16>}, {pipeline_mode = #tpu.pipeline_mode<synchronous>, transform_indices = @transform_5, window_bounds = array<i64: 1, 16>}, {transform_indices = @transform_6, window_bounds = array<i64: 8, 16>}]} {
    %c0 = arith.constant 0 : index
    %c0_0 = arith.constant 0 : index
    %0 = vector.load %arg1[%c0, %c0_0] : memref<8x16xf32, #tpu.memory_space<vmem>>, vector<8x16xf32>
    %c0_1 = arith.constant 0 : index
    %c0_2 = arith.constant 0 : index
    %1 = vector.load %arg2[%c0_1, %c0_2] : memref<8x1xi32, #tpu.memory_space<vmem>>, vector<8x1xi32>
    %2 = tpu.iota {dimensions = array<i32: 1>} : vector<8x4xi32>
    %3 = vector.broadcast %1 : vector<8x1xi32> to vector<8x4xi32>
    %4 = arith.cmpi eq, %2, %3 : vector<8x4xi32>
    %5 = arith.extui %4 : vector<8x4xi1> to vector<8x4xi32>
    %6 = arith.sitofp %5 : vector<8x4xi32> to vector<8x4xf32>
    %c0_3 = arith.constant 0 : index
    %c0_4 = arith.constant 0 : index
    %7 = vector.load %arg3[%c0_3, %c0_4] : memref<16x32xf32, #tpu.memory_space<vmem>>, vector<16x32xf32>
    %cst = arith.constant dense<0.000000e+00> : vector<8x32xf32>
    %8 = tpu.matmul %0, %7, %cst {dimension_numbers = #tpu.dot_dimension_numbers<[1], [0], [0], [1], [0, 0, 1, 1], [], []>} : vector<8x16xf32>, vector<16x32xf32>, vector<8x32xf32> -> vector<8x32xf32>
    %c0_5 = arith.constant 0 : index
    %c0_6 = arith.constant 0 : index
    %9 = vector.load %arg4[%c0_5, %c0_6] : memref<4x32xf32, #tpu.memory_space<vmem>>, vector<4x32xf32>
    %cst_7 = arith.constant dense<0.000000e+00> : vector<8x32xf32>
    %10 = tpu.matmul %6, %9, %cst_7 {dimension_numbers = #tpu.dot_dimension_numbers<[1], [0], [0], [1], [0, 0, 1, 1], [], []>} : vector<8x4xf32>, vector<4x32xf32>, vector<8x32xf32> -> vector<8x32xf32>
    %11 = arith.addf %8, %10 : vector<8x32xf32>
    %cst_8 = arith.constant 0.000000e+00 : f32
    %12 = vector.broadcast %cst_8 : f32 to vector<8x32xf32>
    %13 = arith.maximumf %11, %12 : vector<8x32xf32>
    %c0_9 = arith.constant 0 : index
    %c0_10 = arith.constant 0 : index
    %14 = vector.load %arg5[%c0_9, %c0_10] : memref<32x16xf32, #tpu.memory_space<vmem>>, vector<32x16xf32>
    %cst_11 = arith.constant dense<0.000000e+00> : vector<8x16xf32>
    %15 = tpu.matmul %13, %14, %cst_11 {dimension_numbers = #tpu.dot_dimension_numbers<[1], [0], [0], [1], [0, 0, 1, 1], [], []>} : vector<8x32xf32>, vector<32x16xf32>, vector<8x16xf32> -> vector<8x16xf32>
    %c0_12 = arith.constant 0 : index
    %c0_13 = arith.constant 0 : index
    %16 = vector.load %arg6[%c0_12, %c0_13] : memref<1x16xf32, #tpu.memory_space<vmem>>, vector<1x16xf32>
    %17 = vector.broadcast %16 : vector<1x16xf32> to vector<8x16xf32>
    %18 = arith.addf %15, %17 : vector<8x16xf32>
    %c0_14 = arith.constant 0 : index
    %c0_15 = arith.constant 0 : index
    %19 = vector.load %arg7[%c0_14, %c0_15] : memref<8x16xf32, #tpu.memory_space<vmem>>, vector<8x16xf32>
    tpu.vector_store %arg7[%c0_14, %c0_15], %18 {strides = array<i32>} : memref<8x16xf32, #tpu.memory_space<vmem>>, vector<8x16xf32>,
    return
  }
  func.func @transform_0(%arg0: i32) -> (i32, i32) {
    %c0_i32 = arith.constant 0 : i32
    %c0_i32_0 = arith.constant 0 : i32
    return %arg0, %c0_i32 : i32, i32
  }
  func.func @transform_1(%arg0: i32) -> (i32, i32) {
    %c0_i32 = arith.constant 0 : i32
    %c0_i32_0 = arith.constant 0 : i32
    return %arg0, %c0_i32 : i32, i32
  }
  func.func @transform_2(%arg0: i32) -> (i32, i32) {
    %c0_i32 = arith.constant 0 : i32
    %c0_i32_0 = arith.constant 0 : i32
    %c0_i32_1 = arith.constant 0 : i32
    return %c0_i32, %c0_i32_0 : i32, i32
  }
  func.func @transform_3(%arg0: i32) -> (i32, i32) {
    %c0_i32 = arith.constant 0 : i32
    %c0_i32_0 = arith.constant 0 : i32
    %c0_i32_1 = arith.constant 0 : i32
    return %c0_i32, %c0_i32_0 : i32, i32
  }
  func.func @transform_4(%arg0: i32) -> (i32, i32) {
    %c0_i32 = arith.constant 0 : i32
    %c0_i32_0 = arith.constant 0 : i32
    %c0_i32_1 = arith.constant 0 : i32
    return %c0_i32, %c0_i32_0 : i32, i32
  }
  func.func @transform_5(%arg0: i32) -> (i32, i32) {
    %c0_i32 = arith.constant 0 : i32
    %c0_i32_0 = arith.constant 0 : i32
    %c0_i32_1 = arith.constant 0 : i32
    return %c0_i32, %c0_i32_0 : i32, i32
  }
  func.func @transform_6(%arg0: i32) -> (i32, i32) {
    %c0_i32 = arith.constant 0 : i32
    %c0_i32_0 = arith.constant 0 : i32
    return %arg0, %c0_i32 : i32, i32
  }
}

</mosaic_0001>

<bundles_post_ra>
// kernel: predictor_forward.1
= control target key start
LH: loop header
LB: loop body
LE: loop exit
PB: predicated region body
PF: predicated region fallthrough
CT: control target
= control target key end

     0   :  { %s457_s0 = inlined_call_operand.vmem [shape: f32[8,16], index: 0, kind: input, shape index: {}]   ;;  %s458_s1 = inlined_call_operand.vmem [shape: s32[8,1], index: 1, kind: input, shape index: {}]   ;;  %s459_s2 = inlined_call_operand.vmem [shape: f32[16,32], index: 2, kind: input, shape index: {}]   ;;  %s460_s3 = inlined_call_operand.vmem [shape: f32[4,32], index: 3, kind: input, shape index: {}]   ;;  %s461_s4 = inlined_call_operand.vmem [shape: f32[32,16], index: 4, kind: input, shape index: {}]   ;;  %s462_s5 = inlined_call_operand.vmem [shape: f32[1,16], index: 5, kind: input, shape index: {}]   ;;  %s463_s6 = inlined_call_operand.hbm [shape: f32[8,16], index: 6, kind: output, shape index: {}]  }
   0x1   :  { %v25_v0 = vld [vmem:[%s458_s1] sm:$0xff] }
   0x2   :  { %11 = vsyncpa [#allocation3], 0  ;;  %v370_v1 = vmov 0   ;;  %v371_v2 = vmov 0.0   ;;  %v36_v3 = vld [vmem:[%s460_s3] sm:$0xf]  ;;  %v26_v8 = vlaneseq }
   0x3   :  { %345 = vset.pattern.permute.xlu0 %v370_v1  ;;  %306 = vmatprep.subr.mxu0 %v371_v2  ;;  %vm41_vm0 = vcmask 1043456   ;;  %vm372_vm1 = vmmov 0   ;;  %v373_v4 = vmov 0.0|0.0   ;;  %v190_v5 = vld [vmem:[%s461_s4] sm:$0xff]  ;;  %v191_v6 = vld [vmem:[%s461_s4 + $0x8] sm:$0xff]  ;;  %vm37_vm2 = vcmask 31744  }
   0x4   :  { %29 = vperm.xlu0 %345, %v25_v0   ;;  %307 = vmatpush3.msk.msra.mxu0 %vm41_vm0, %v36_v3  ;;  %v333_v7 = vpack.c.bf16 %v191_v6, %v190_v5  ;;  %v27_v9 = vand.u32 127, %v26_v8  ;;  %v34_v10 = vld [vmem:[%s459_s2] sm:$0xff]  ;;  %v35_v11 = vld [vmem:[%s459_s2 + $0x8] sm:$0xff]  ;;  %vm115_vm4 = vcmask 130048   ;;  %v192_v16 = vld [vmem:[%s461_s4 + $0x10] sm:$0xff]  ;;  %vm201_vm5 = vcmask 261120  }
   0x5   :  { %308 = vmatprep.mubr.msk.f32.mxu0 %vm372_vm1, %v371_v2  ;;  %329 = vmatprep.subr.bf16.mxu0 %v373_v4  ;;  %v330_v13 = vpack.c.bf16 %v35_v11, %v34_v10  ;;  %v24_v15 = vld [vmem:[%s457_s0] sm:$0xff]  ;;  %v193_v17 = vld [vmem:[%s461_s4 + $0x18] sm:$0xff]  ;;  %s374_s13 = smov [#allocation2]  }
   0x6   :  { %332 = vmatprep.subr.bf16.mxu1 %v373_v4  ;;  %326 = vmatprep.mubr.msk.f32.mxu1 %vm372_vm1, %v371_v2  ;;  %v336_v18 = vpack.c.bf16 %v193_v17, %v192_v16  ;;  %v294_v22 = vld [vmem:[%s462_s5] ss:$0 sm:$0xff]  ;;  %s282_s14 = sshll.u32 %s374_s13, 4  ;;  %s283_s14 = int_to_ptr.vmem [resolvable:$true] %s282_s14 }
   0x7   :  { %334 = vmatpush3.bf16.msra.mxu1 %v333_v7  ;;  %s346_s4 = scalar_lea.vmem %s283_s14, 128  ;;  %p351_p1 = scmp.lt.s32.totalorder %s283_s14, %s283_s14 }
   0x8   :  { %335 = vmatprep.subr.bf16.mxu1 %v373_v4  ;;  %p347_p0 = scmp.ne.s32.totalorder %s283_s14, %s346_s4  ;;  %p352_p2 = scmp.lt.s32.totalorder %s346_s4, %s346_s4 }
   0xa   :  { %p353_p3 = por %p352_p2, %p351_p1 }
   0xb   :  { %337 = vmatpush3.bf16.msra.mxu1 %v336_v18 }
   0xc   :  { %p354_p4 = pnand %p353_p3, %p347_p0 }
  0x83   :  { %v30_v12 = vpop.permute.xlu0 %29 }
  0x84   :  { %vm31_vm3 = vcmp.eq.s32.totalorder %v27_v9, %v30_v12 }
  0x85   :  { %v290_v14 = vsel %vm31_vm3, 1.0, %v371_v2 }
  0x86   :  { %309 = vmatmul.mubr.msk.f32.vlgmr.msra.gmra.mrb[0].mxu0 %vm37_vm2, %v290_v14 }
  0x87   :  { %331 = vmatpush3.bf16.msra.mxu0 %v330_v13  ;;  %315 = vmatprep.mubr.msk.f32.mxu0 %vm372_vm1, %v371_v2 }
  0x8e   :  { %316 = vmatmul.mubr.msk.f32.vlgmr.msra.gmra.mrb[0].mxu0 %vm115_vm4, %v24_v15 }
 0x161   :  { %v185_v19 = vpop.f32.mrb[0].mxu0 }
 0x162   :  { %v189_v20 = vmax.f32 %v185_v19, 0.0  ;;  %v317_v21 = vpop.f32.mrb[1].mxu0 }
 0x164   :  { %327 = vmatmul.mubr.msk.f32.vlgmr.msra.gmra.mrb[0].mxu1 %vm201_vm5, %v189_v20 }
 0x237   :  { %v271_v23 = vpop.f32.mrb[0].mxu1 }
 0x238   :  { %v272_v24 = vadd.f32 %v294_v22, %v271_v23  ;;  %v328_v25 = vpop.f32.mrb[1].mxu1 }
 0x23a   :  { %275 = vst.msk [vmem:[#allocation2] sm:$0xff] %vm115_vm4, %v272_v24 }
 0x23b   :  { %357 = shalt.err (!%p354_p4)
}
 0x23c   :  { %s358_s17 = scalar_lea.hbm %s463_s6, 128 }
 0x23d   :  { %p359_p5 = scmp.ne.s32.totalorder %s463_s6, %s358_s17  ;;  %p362_p6 = scmp.lt.u32.totalorder %s358_s17, %s463_s6 }
 0x23f   :  { %p364_p7 = pnand %p362_p6, %p359_p5 }
 0x241   :  { %367 = shalt.err (!%p364_p7)
}
 0x242   :  { %285 = dma.vmem_to_hbm [thread:$0]  %s283_s14, 128, %s463_s6, [#allocation3]  }
 0x243   :  { %368 = dma.done.wait [#allocation3], 128  }
 0x244   :  { %369 = vsyncadd [#allocation3], 4294967168 }
 0x245   :  { %289 = vsyncpa [#allocation3], 1 }

</bundles_post_ra>
